<compile_context>
chip_gen: v6e
topology: v6e:2x2x1
jax: 0.10.0
libtpu: 0.0.40
codegen_flags: <defaults>
</compile_context>

<pallas_src>
import jax
import jax.numpy as jnp
from jax.experimental import pallas as pl
from jax.experimental.pallas import tpu as pltpu

LANE = 128          # lane width / MXU-friendly feature padding
SUBLANE_BF16 = 16   # bf16 packs 16 sublanes per vreg -> batch granularity


def _round_up(x, m):
    return ((x + m - 1) // m) * m


# ----------------------------------------------------------------------------
# Kernel: x @ W01 + b01 -> ReLU -> @ W2 + b2   (Linear0 folded into Linear1)
# ----------------------------------------------------------------------------
def mlp_kernel(x_ref, w01_ref, b01_ref, w2_ref, b2_ref, o_ref):
    # x tile: (TM, FP) bf16; weights bf16; biases f32 (1, N); output bf16.
    h = jnp.dot(x_ref[...], w01_ref[...],
                preferred_element_type=jnp.float32) + b01_ref[...]
    h = jnp.maximum(h, 0.0)                                   # ReLU
    # Final Linear (n1 -> n2); the trailing ReLU was popped in the module.
    o_ref[...] = (jnp.dot(h.astype(jnp.bfloat16), w2_ref[...],
                          preferred_element_type=jnp.float32)
                  + b2_ref[...]).astype(o_ref.dtype)


# ----------------------------------------------------------------------------
# One-time parameter preparation (fold + cast + pad).  NOT per-forward.
# ----------------------------------------------------------------------------
def prepare_params(params):
    """Fold Linear0 into Linear1 (exact at f32 master precision), cast weights
    to bf16, zero-pad everything to lane-dense (multiple-of-128) shapes."""
    w0, b0 = params["w0"], params["b0"]
    w1, b1 = params["w1"], params["b1"]
    w2, b2 = params["w2"], params["b2"]
    n_in, n1, n2 = w0.shape[0], w1.shape[1], w2.shape[1]

    # Fold in f32 (Identity activation between layer 0 and 1 => exact).
    w01 = w0.astype(jnp.float32) @ w1.astype(jnp.float32)                 # (n_in, n1)
    b01 = (b0.reshape(1, -1).astype(jnp.float32) @ w1.astype(jnp.float32)
           + b1.reshape(1, -1).astype(jnp.float32))                       # (1, n1)

    FP = _round_up(n_in, LANE)
    N1P = _round_up(n1, LANE)
    N2P = _round_up(n2, LANE)

    def pad2(a, rows, cols, dtype):
        a = a.astype(dtype)
        return jnp.pad(a, ((0, rows - a.shape[0]), (0, cols - a.shape[1])))

    prepped = {
        "w01": pad2(w01, FP, N1P, jnp.bfloat16),
        "b01": pad2(b01, 1, N1P, jnp.float32),   # zero-padded bias: relu(0)=0 exact
        "w2":  pad2(w2, N1P, N2P, jnp.bfloat16),
        "b2":  pad2(b2.reshape(1, -1), 1, N2P, jnp.float32),
    }
    meta = {"n_in": n_in, "n_out": n2, "FP": FP, "N1P": N1P, "N2P": N2P}
    return prepped, meta


# ----------------------------------------------------------------------------
# Forward wrapper
# ----------------------------------------------------------------------------
def neural_network_forward(x, prepped, meta, *, tile_m=1024):
    """x: (B, ...) ; prepped/meta from prepare_params().  Returns (B, n2) f32."""
    B = x.shape[0]
    x2d = x.reshape(B, -1).astype(jnp.bfloat16)        # nn.Flatten, straight to bf16
    F = x2d.shape[1]
    assert F == meta["n_in"], "flattened input dim must equal num_nodes_per_layer[0]"

    FP, N1P, N2P = meta["FP"], meta["N1P"], meta["N2P"]
    n_out = meta["n_out"]

    # --- batch padding / tiling (16-row granularity for bf16 sublane packing) --
    BP0 = _round_up(max(B, SUBLANE_BF16), SUBLANE_BF16)
    tm = max(SUBLANE_BF16, _round_up(min(tile_m, BP0), SUBLANE_BF16))
    if BP0 >= 2 * SUBLANE_BF16 and tm >= BP0:
        # Keep >= 2 grid steps so the "parallel" batch axis can shard across
        # v7x's two TensorCores instead of idling one.
        tm = _round_up((BP0 + 1) // 2, SUBLANE_BF16)
    BP = _round_up(BP0, tm)
    grid = (BP // tm,)

    # Only x is padded per call (weights were prepped once).
    x_p = jnp.pad(x2d, ((0, BP - B), (0, FP - F)))

    w01, b01, w2, b2 = prepped["w01"], prepped["b01"], prepped["w2"], prepped["b2"]

    # --- BlockSpecs: x/out tiled over batch, weights/biases VMEM-resident ------
    in_specs = [
        pl.BlockSpec((tm, FP),   lambda i: (i, 0)),    # x: batch-tiled
        pl.BlockSpec((FP, N1P),  lambda i: (0, 0)),    # W01: resident
        pl.BlockSpec((1, N1P),   lambda i: (0, 0)),    # b01: resident
        pl.BlockSpec((N1P, N2P), lambda i: (0, 0)),    # W2: resident
        pl.BlockSpec((1, N2P),   lambda i: (0, 0)),    # b2: resident
    ]
    out_spec = pl.BlockSpec((tm, N2P), lambda i: (i, 0))

    # --- cost hint for the XLA scheduler ---------------------------------------
    flops = 2 * BP * (FP * N1P + N1P * N2P)
    bytes_accessed = (
        x_p.size * 2
        + (w01.size + w2.size) * 2
        + (b01.size + b2.size) * 4
        + BP * N2P * 2                       # bf16 output
    )
    cost = pl.CostEstimate(flops=flops, transcendentals=0,
                           bytes_accessed=int(bytes_accessed))

    out_padded = pl.pallas_call(
        mlp_kernel,
        out_shape=jax.ShapeDtypeStruct((BP, N2P), jnp.bfloat16),
        grid=grid,
        in_specs=in_specs,
        out_specs=out_spec,
        compiler_params=pltpu.CompilerParams(
            dimension_semantics=("parallel",)),   # megacore sharding on v7x
        cost_estimate=cost,
    )(x_p, w01, b01, w2, b2)

    # strip batch + feature padding; return f32 like the PyTorch module
    return out_padded[:B, :n_out].astype(jnp.float32)


# ----------------------------------------------------------------------------
# Parameter init + references
# ----------------------------------------------------------------------------
def init_params(key, num_nodes_per_layer):
    """Deterministic init mimicking nn.Linear's U(-1/sqrt(fan_in), 1/sqrt(fan_in)).

    Layer structure for layers=3, nodes=[n0, n1, n2]:
      Linear(n0, n0), Linear(n0, n1), Linear(n1, n2)
    Weights stored as (in, out), f32 master copies.
    """
    n0, n1, n2 = num_nodes_per_layer
    dims = [(n0, n0), (n0, n1), (n1, n2)]
    params = {}
    for idx, (fan_in, fan_out) in enumerate(dims):
        key, kw, kb = jax.random.split(key, 3)
        bound = 1.0 / (fan_in ** 0.5)
        params[f"w{idx}"] = jax.random.uniform(
            kw, (fan_in, fan_out), jnp.float32, minval=-bound, maxval=bound)
        params[f"b{idx}"] = jax.random.uniform(
            kb, (1, fan_out), jnp.float32, minval=-bound, maxval=bound)
    return params


def reference_forward_f32(x, params):
    """Pure-f32 reference (PyTorch semantics)."""
    B = x.shape[0]
    h = x.reshape(B, -1).astype(jnp.float32)
    h = h @ params["w0"] + params["b0"]
    h = jnp.maximum(h @ params["w1"] + params["b1"], 0.0)
    return h @ params["w2"] + params["b2"]


def reference_forward_bf16(x, params):
    """Reference matching the kernel's folded bf16 math (f32 accumulate, bf16 out)."""
    B = x.shape[0]
    w01 = params["w0"].astype(jnp.float32) @ params["w1"].astype(jnp.float32)
    b01 = (params["b0"].reshape(1, -1) @ params["w1"]
           + params["b1"].reshape(1, -1)).astype(jnp.float32)
    h = x.reshape(B, -1).astype(jnp.bfloat16)
    h = jnp.dot(h, w01.astype(jnp.bfloat16),
                preferred_element_type=jnp.float32) + b01
    h = jnp.maximum(h, 0.0)
    o = jnp.dot(h.astype(jnp.bfloat16), params["w2"].astype(jnp.bfloat16),
                preferred_element_type=jnp.float32) + params["b2"].reshape(1, -1)
    return o.astype(jnp.bfloat16).astype(jnp.float32)


if __name__ == "__main__":
    # Module config: layers=3, num_nodes_per_layer=[32, 64, 16]
    num_nodes_per_layer = [32, 64, 16]

    key = jax.random.PRNGKey(0)
    key, kx, kp = jax.random.split(key, 3)

    # Input (B, C, L) with C*L == num_nodes_per_layer[0] = 32
    x = jax.random.normal(kx, (2, 4, 8), dtype=jnp.float32)
    params = init_params(kp, num_nodes_per_layer)

    # One-time param prep (fold Linear0 into Linear1, cast, pad).
    prepped, meta = prepare_params(params)
    prepped = jax.tree_util.tree_map(jax.block_until_ready, prepped)

    out = neural_network_forward(x, prepped, meta)
    out = jax.block_until_ready(out)
    assert out.shape == (2, num_nodes_per_layer[-1])

    # Tight check vs a reference using the same folded bf16/f32-accumulate math.
    ref_bf16 = reference_forward_bf16(x, params)
    assert jnp.allclose(out, ref_bf16, atol=1e-2, rtol=1e-2), \
        "mismatch vs bf16-matched JAX reference"

    # Loose sanity check vs the pure-f32 PyTorch-semantics reference
    # (bf16 inputs/weights/output introduce ~1e-2 relative error).
    ref_f32 = reference_forward_f32(x, params)
    assert jnp.allclose(out, ref_f32, atol=5e-2, rtol=5e-2), \
        "mismatch vs f32 JAX reference"

    print("KERNEL_OK")
</pallas_src>

<mosaic_0001>
module attributes {stable_mosaic.version = 11 : i64} {
  func.func @mlp_kernel(%arg0: i32, %arg1: memref<16x128xbf16, #tpu.memory_space<vmem>>, %arg2: memref<128x128xbf16, #tpu.memory_space<vmem>>, %arg3: memref<1x128xf32, #tpu.memory_space<vmem>>, %arg4: memref<128x128xbf16, #tpu.memory_space<vmem>>, %arg5: memref<1x128xf32, #tpu.memory_space<vmem>>, %arg6: memref<16x128xbf16, #tpu.memory_space<vmem>>) attributes {dimension_semantics = [#tpu.dimension_semantics<parallel>], iteration_bounds = array<i64: 1>, scalar_prefetch = 0 : i64, scratch_operands = 0 : i64, tpu.core_type = #tpu.core_type<tc>, window_params = [{transform_indices = @transform_0, window_bounds = array<i64: 16, 128>}, {pipeline_mode = #tpu.pipeline_mode<synchronous>, transform_indices = @transform_1, window_bounds = array<i64: 128, 128>}, {pipeline_mode = #tpu.pipeline_mode<synchronous>, transform_indices = @transform_2, window_bounds = array<i64: 1, 128>}, {pipeline_mode = #tpu.pipeline_mode<synchronous>, transform_indices = @transform_3, window_bounds = array<i64: 128, 128>}, {pipeline_mode = #tpu.pipeline_mode<synchronous>, transform_indices = @transform_4, window_bounds = array<i64: 1, 128>}, {transform_indices = @transform_5, window_bounds = array<i64: 16, 128>}]} {
    %c0 = arith.constant 0 : index
    %c0_0 = arith.constant 0 : index
    %0 = vector.load %arg1[%c0, %c0_0] : memref<16x128xbf16, #tpu.memory_space<vmem>>, vector<16x128xbf16>
    %c0_1 = arith.constant 0 : index
    %c0_2 = arith.constant 0 : index
    %1 = vector.load %arg2[%c0_1, %c0_2] : memref<128x128xbf16, #tpu.memory_space<vmem>>, vector<128x128xbf16>
    %cst = arith.constant dense<0.000000e+00> : vector<16x128xf32>
    %2 = tpu.matmul %0, %1, %cst {dimension_numbers = #tpu.dot_dimension_numbers<[1], [0], [0], [1], [0, 0, 1, 1], [], []>} : vector<16x128xbf16>, vector<128x128xbf16>, vector<16x128xf32> -> vector<16x128xf32>
    %c0_3 = arith.constant 0 : index
    %c0_4 = arith.constant 0 : index
    %3 = vector.load %arg3[%c0_3, %c0_4] : memref<1x128xf32, #tpu.memory_space<vmem>>, vector<1x128xf32>
    %4 = vector.broadcast %3 : vector<1x128xf32> to vector<16x128xf32>
    %5 = arith.addf %2, %4 : vector<16x128xf32>
    %cst_5 = arith.constant 0.000000e+00 : f32
    %6 = vector.broadcast %cst_5 : f32 to vector<16x128xf32>
    %7 = arith.maximumf %5, %6 : vector<16x128xf32>
    %8 = arith.truncf %7 : vector<16x128xf32> to vector<16x128xbf16>
    %c0_6 = arith.constant 0 : index
    %c0_7 = arith.constant 0 : index
    %9 = vector.load %arg4[%c0_6, %c0_7] : memref<128x128xbf16, #tpu.memory_space<vmem>>, vector<128x128xbf16>
    %cst_8 = arith.constant dense<0.000000e+00> : vector<16x128xf32>
    %10 = tpu.matmul %8, %9, %cst_8 {dimension_numbers = #tpu.dot_dimension_numbers<[1], [0], [0], [1], [0, 0, 1, 1], [], []>} : vector<16x128xbf16>, vector<128x128xbf16>, vector<16x128xf32> -> vector<16x128xf32>
    %c0_9 = arith.constant 0 : index
    %c0_10 = arith.constant 0 : index
    %11 = vector.load %arg5[%c0_9, %c0_10] : memref<1x128xf32, #tpu.memory_space<vmem>>, vector<1x128xf32>
    %12 = vector.broadcast %11 : vector<1x128xf32> to vector<16x128xf32>
    %13 = arith.addf %10, %12 : vector<16x128xf32>
    %14 = arith.truncf %13 : vector<16x128xf32> to vector<16x128xbf16>
    %c0_11 = arith.constant 0 : index
    %c0_12 = arith.constant 0 : index
    %15 = vector.load %arg6[%c0_11, %c0_12] : memref<16x128xbf16, #tpu.memory_space<vmem>>, vector<16x128xbf16>
    tpu.vector_store %arg6[%c0_11, %c0_12], %14 {strides = array<i32>} : memref<16x128xbf16, #tpu.memory_space<vmem>>, vector<16x128xbf16>,
    return
  }
  func.func @transform_0(%arg0: i32) -> (i32, i32) {
    %c0_i32 = arith.constant 0 : i32
    %c0_i32_0 = arith.constant 0 : i32
    return %arg0, %c0_i32 : i32, i32
  }
  func.func @transform_1(%arg0: i32) -> (i32, i32) {
    %c0_i32 = arith.constant 0 : i32
    %c0_i32_0 = arith.constant 0 : i32
    %c0_i32_1 = arith.constant 0 : i32
    return %c0_i32, %c0_i32_0 : i32, i32
  }
  func.func @transform_2(%arg0: i32) -> (i32, i32) {
    %c0_i32 = arith.constant 0 : i32
    %c0_i32_0 = arith.constant 0 : i32
    %c0_i32_1 = arith.constant 0 : i32
    return %c0_i32, %c0_i32_0 : i32, i32
  }
  func.func @transform_3(%arg0: i32) -> (i32, i32) {
    %c0_i32 = arith.constant 0 : i32
    %c0_i32_0 = arith.constant 0 : i32
    %c0_i32_1 = arith.constant 0 : i32
    return %c0_i32, %c0_i32_0 : i32, i32
  }
  func.func @transform_4(%arg0: i32) -> (i32, i32) {
    %c0_i32 = arith.constant 0 : i32
    %c0_i32_0 = arith.constant 0 : i32
    %c0_i32_1 = arith.constant 0 : i32
    return %c0_i32, %c0_i32_0 : i32, i32
  }
  func.func @transform_5(%arg0: i32) -> (i32, i32) {
    %c0_i32 = arith.constant 0 : i32
    %c0_i32_0 = arith.constant 0 : i32
    return %arg0, %c0_i32 : i32, i32
  }
}

</mosaic_0001>

<bundles_post_ra>
// kernel: tpu_custom_call.1
= control target key start
LH: loop header
LB: loop body
LE: loop exit
PB: predicated region body
PF: predicated region fallthrough
CT: control target
= control target key end

     0   :  { %10 = vsyncpa [#allocation3], 0  ;;  %s591_s0 = inlined_call_operand.hbm [shape: bf16[16,128], index: 0, kind: input, shape index: {}]   ;;  %s592_s1 = inlined_call_operand.hbm [shape: bf16[128,128], index: 1, kind: input, shape index: {}]   ;;  %s593_s2 = inlined_call_operand.vmem [shape: f32[1,128], index: 2, kind: input, shape index: {}]   ;;  %s594_s3 = inlined_call_operand.hbm [shape: bf16[128,128], index: 3, kind: input, shape index: {}]   ;;  %s595_s4 = inlined_call_operand.vmem [shape: f32[1,128], index: 4, kind: input, shape index: {}]   ;;  %s596_s5 = inlined_call_operand.hbm [shape: bf16[16,128], index: 5, kind: output, shape index: {}]  }
   0x1   :  { %11 = vsyncpa [#allocation6], 0 }
   0x2   :  { %12 = vsyncpa [#allocation4], 0  ;;  %s523_s18 = smov [#allocation5]   ;;  %s524_s20 = smov [#allocation2]  }
   0x3   :  { %s30_s19 = sshll.u32 %s523_s18, 4  ;;  %s18_s21 = sshll.u32 %s524_s20, 4  ;;  %s31_s19 = int_to_ptr.vmem [resolvable:$true] %s30_s19  ;;  %s19_s21 = int_to_ptr.vmem [resolvable:$true] %s18_s21 }
   0x4   :  { %s445_s22 = scalar_lea.vmem %s31_s19, 1024  ;;  %p450_p1 = scmp.lt.s32.totalorder %s31_s19, %s31_s19 }
   0x5   :  { %p446_p0 = scmp.ne.s32.totalorder %s31_s19, %s445_s22  ;;  %p451_p2 = scmp.lt.s32.totalorder %s445_s22, %s445_s22 }
   0x7   :  { %p452_p3 = por %p451_p2, %p450_p1 }
   0x9   :  { %p453_p4 = pnand %p452_p3, %p446_p0 }
   0xb   :  { %456 = shalt.err (!%p453_p4)
}
   0xc   :  { %s525_s23 = smov 64   ;;  %s526_s24 = smov 4  }
   0xd   :  { %36 = dma.hbm_to_vmem [thread:$0]  %s592_s1, 1024, %s31_s19, [#allocation6], %s525_s23, %s525_s23, %s526_s24  }
   0xe   :  { %s465_s27 = scalar_lea.vmem %s19_s21, 128  ;;  %p470_p6 = scmp.lt.s32.totalorder %s19_s21, %s19_s21 }
   0xf   :  { %p466_p5 = scmp.ne.s32.totalorder %s19_s21, %s465_s27  ;;  %p471_p7 = scmp.lt.s32.totalorder %s465_s27, %s465_s27 }
  0x11   :  { %p472_p8 = por %p471_p7, %p470_p6 }
  0x13   :  { %p473_p9 = pnand %p472_p8, %p466_p5 }
  0x15   :  { %476 = shalt.err (!%p473_p9)
}
  0x16   :  { %24 = dma.hbm_to_vmem [thread:$0]  %s591_s0, 128, %s19_s21, [#allocation3], %s525_s23, %s525_s23, %s526_s24  }
  0x17   :  { %s527_s30 = smov [#allocation7]  }
  0x18   :  { %s44_s6 = sshll.u32 %s527_s30, 4  ;;  %s45_s6 = int_to_ptr.vmem [resolvable:$true] %s44_s6 }
  0x19   :  { %s485_s7 = scalar_lea.vmem %s45_s6, 1024  ;;  %p490_p11 = scmp.lt.s32.totalorder %s45_s6, %s45_s6 }
  0x1a   :  { %p486_p10 = scmp.ne.s32.totalorder %s45_s6, %s485_s7  ;;  %p491_p12 = scmp.lt.s32.totalorder %s485_s7, %s485_s7 }
  0x1c   :  { %p492_p13 = por %p491_p12, %p490_p11 }
  0x1e   :  { %p493_p0 = pnand %p492_p13, %p486_p10 }
  0x20   :  { %496 = shalt.err (!%p493_p0)
}
  0x21   :  { %50 = dma.hbm_to_vmem [thread:$0]  %s594_s3, 1024, %s45_s6, [#allocation6], %s525_s23, %s525_s23, %s526_s24  }
  0x22   :  { %517 = dma.done.wait [#allocation3], 128  }
  0x23   :  { %518 = vsyncadd [#allocation3], 4294967168 }
  0x24   :  { %519 = dma.done.wait [#allocation6], 2048  }
  0x25   :  { %520 = vsyncadd [#allocation6], 4294965248  ;;  %v528_v0 = vmov 0.0   ;;  %vm529_vm0 = vmmov 0   ;;  %v420_v1 = vld [vmem:[#allocation5 + $0x38] sm:$0xff]   ;;  %v421_v2 = vld [vmem:[#allocation5 + $0x30] sm:$0xff]  }
  0x26   :  { %372 = vmatprep.subr.bf16.mxu0 %v528_v0  ;;  %388 = vmatprep.mubr.msk.bf16.mxu0 %vm529_vm0, %v528_v0  ;;  %v422_v3 = vld [vmem:[#allocation5 + $0x28] sm:$0xff]   ;;  %v429_v4 = vld [vmem:[#allocation7 + $0x38] sm:$0xff]   ;;  %v423_v5 = vld [vmem:[#allocation5 + $0x20] sm:$0xff]   ;;  %s530_s11 = smov [#allocation8]  }
  0x27   :  { %392 = vmatprep.subr.bf16.mxu1 %v528_v0  ;;  %408 = vmatprep.mubr.msk.bf16.mxu1 %vm529_vm0, %v528_v0  ;;  %v430_v6 = vld [vmem:[#allocation7 + $0x30] sm:$0xff]   ;;  %v424_v7 = vld [vmem:[#allocation5 + $0x18] sm:$0xff]   ;;  %v431_v8 = vld [vmem:[#allocation7 + $0x28] sm:$0xff]   ;;  %s313_s12 = sshll.u32 %s530_s11, 4  ;;  %s314_s12 = int_to_ptr.vmem [resolvable:$true] %s313_s12 }
  0x28   :  { %373 = vmatpush3.bf16.msra.mxu0 %v420_v1  ;;  %393 = vmatpush3.bf16.msra.mxu1 %v429_v4  ;;  %v425_v9 = vld [vmem:[#allocation5 + $0x10] sm:$0xff]   ;;  %v432_v10 = vld [vmem:[#allocation7 + $0x20] sm:$0xff]   ;;  %v426_v11 = vld [vmem:[#allocation5 + $0x8] sm:$0xff]   ;;  %p502_p2 = scmp.lt.s32.totalorder %s314_s12, %s314_s12 }
  0x29   :  { %374 = vmatprep.subr.bf16.mxu0 %v528_v0  ;;  %394 = vmatprep.subr.bf16.mxu1 %v528_v0  ;;  %v433_v12 = vld [vmem:[#allocation7 + $0x18] sm:$0xff]   ;;  %v427_v13 = vld [vmem:[#allocation5] sm:$0xff]   ;;  %v434_v15 = vld [vmem:[#allocation7 + $0x10] sm:$0xff]  }
  0x2a   :  { %v428_v14 = vld [vmem:[#allocation2] sm:$0xff]   ;;  %v435_v16 = vld [vmem:[#allocation7 + $0x8] sm:$0xff]   ;;  %v436_v17 = vld [vmem:[#allocation7] sm:$0xff]  }
  0x2b   :  { %v326_v18 = vld [vmem:[%s593_s2] ss:$0 sm:$0xff]  ;;  %s497_s2 = scalar_lea.vmem %s314_s12, 128 }
  0x2c   :  { %375 = vmatpush3.bf16.msra.mxu0 %v421_v2  ;;  %395 = vmatpush3.bf16.msra.mxu1 %v430_v6  ;;  %v336_v29 = vld [vmem:[%s595_s4] ss:$0 sm:$0xff]  ;;  %p498_p1 = scmp.ne.s32.totalorder %s314_s12, %s497_s2  ;;  %p503_p3 = scmp.lt.s32.totalorder %s497_s2, %s497_s2 }
  0x2d   :  { %376 = vmatprep.subr.bf16.mxu0 %v528_v0  ;;  %396 = vmatprep.subr.bf16.mxu1 %v528_v0 }
  0x2e   :  { %p504_p4 = por %p503_p3, %p502_p2 }
  0x30   :  { %377 = vmatpush3.bf16.msra.mxu0 %v422_v3  ;;  %397 = vmatpush3.bf16.msra.mxu1 %v431_v8  ;;  %p505_p5 = pnand %p504_p4, %p498_p1 }
  0x31   :  { %378 = vmatprep.subr.bf16.mxu0 %v528_v0  ;;  %398 = vmatprep.subr.bf16.mxu1 %v528_v0 }
  0x34   :  { %379 = vmatpush3.bf16.msra.mxu0 %v423_v5  ;;  %399 = vmatpush3.bf16.msra.mxu1 %v432_v10 }
  0x35   :  { %380 = vmatprep.subr.bf16.mxu0 %v528_v0  ;;  %400 = vmatprep.subr.bf16.mxu1 %v528_v0 }
  0x38   :  { %381 = vmatpush3.bf16.msra.mxu0 %v424_v7  ;;  %401 = vmatpush3.bf16.msra.mxu1 %v433_v12 }
  0x39   :  { %382 = vmatprep.subr.bf16.mxu0 %v528_v0  ;;  %402 = vmatprep.subr.bf16.mxu1 %v528_v0 }
  0x3c   :  { %383 = vmatpush3.bf16.msra.mxu0 %v425_v9  ;;  %403 = vmatpush3.bf16.msra.mxu1 %v434_v15 }
  0x3d   :  { %384 = vmatprep.subr.bf16.mxu0 %v528_v0  ;;  %404 = vmatprep.subr.bf16.mxu1 %v528_v0 }
  0x40   :  { %385 = vmatpush3.bf16.msra.mxu0 %v426_v11  ;;  %405 = vmatpush3.bf16.msra.mxu1 %v435_v16 }
  0x41   :  { %386 = vmatprep.subr.bf16.mxu0 %v528_v0  ;;  %406 = vmatprep.subr.bf16.mxu1 %v528_v0 }
  0x44   :  { %387 = vmatpush3.bf16.msra.mxu0 %v427_v13  ;;  %407 = vmatpush3.bf16.msra.mxu1 %v436_v17 }
  0x47   :  { %389 = vmatmul.mubr.bf16.vlgmr.msra.gmra.mxu0 %v428_v14 }
 0x107   :  { %v176_v19 = vpop.f32.mrf.mxu0 }
 0x108   :  { %v177_v21 = vadd.f32 %v326_v18, %v176_v19 }
 0x109   :  { %v390_v20 = vpop.f32.mrf.mxu0 }
 0x10a   :  { %v183_v25 = vmax.f32 %v177_v21, 0.0 }
 0x10b   :  { %v179_v22 = vpop.f32.mrf.mxu0 }
 0x10c   :  { %v180_v23 = vadd.f32 %v326_v18, %v179_v22 }
 0x10d   :  { %v391_v24 = vpop.f32.mrf.mxu0 }
 0x10e   :  { %v184_v26 = vmax.f32 %v180_v23, 0.0 }
 0x110   :  { %v185_v27 = vpack.c.bf16 %v184_v26, %v183_v25 }
 0x112   :  { %409 = vmatmul.mubr.bf16.vlgmr.msra.gmra.mxu1 %v185_v27 }
 0x1d2   :  { %v291_v28 = vpop.f32.mrf.mxu1 }
 0x1d3   :  { %v292_v32 = vadd.f32 %v336_v29, %v291_v28 }
 0x1d4   :  { %v410_v30 = vpop.f32.mrf.mxu1 }
 0x1d6   :  { %v294_v31 = vpop.f32.mrf.mxu1 }
 0x1d7   :  { %v295_v33 = vadd.f32 %v336_v29, %v294_v31 }
 0x1d8   :  { %v411_v34 = vpop.f32.mrf.mxu1 }
 0x1d9   :  { %v352_v35 = vpack.c.bf16 %v295_v33, %v292_v32 }
 0x1db   :  { %353 = vst [vmem:[#allocation8] sm:$0xff] %v352_v35  }
 0x1dc   :  { %508 = shalt.err (!%p505_p5)
}
 0x1dd   :  { %319 = dma.vmem_to_hbm [thread:$0]  %s314_s12, 128, %s596_s5, [#allocation4], %s525_s23, %s525_s23, %s526_s24  }
 0x1de   :  { %521 = dma.done.wait [#allocation4], 128  }
 0x1df   :  { %522 = vsyncadd [#allocation4], 4294967168 }
 0x1e0   :  { %323 = vsyncpa [#allocation3], 1 }
 0x1e1   :  { %324 = vsyncpa [#allocation6], 1 }
 0x1e2   :  { %325 = vsyncpa [#allocation4], 1 }

</bundles_post_ra>
